<compile_context>
chip_gen: v7x
topology: tpu7x:2x2x1
jax: 0.10.0
libtpu: 0.0.40
codegen_flags: <defaults>
</compile_context>

<pallas_src>
import jax
import jax.numpy as jnp
from jax.experimental import pallas as pl
from jax.experimental.pallas import tpu as pltpu

LANE = 128
SUBLANE = 8
ROW_ALIGN = 16            # safe second-minor alignment for f32 and bf16 slabs
NUM_PARTIALS = 2          # outer "parallel" axis: 2 TCs on v7x, harmless on 1-TC chips
                          # (verify with xprof that v7x actually shards it; if not,
                          #  switch to pltpu.CORE_PARALLEL / pl.core_map)
TARGET_BLOCK_ROWS = 8192  # (8192, 128) f32 = 4 MiB per input per block


def _round_up(x: int, m: int) -> int:
    return ((x + m - 1) // m) * m


def _make_kernel(beta: float, block_rows: int, steps: int, rows_valid: int, need_mask: bool):
    inv_2beta = 0.5 / beta
    half_beta = 0.5 * beta

    def partial_sum(p, q):
        # d = asinh(p) - asinh(q).  sinh subtraction identity:
        #   z  = sinh(d) = p*sqrt(1+q^2) - q*sqrt(1+p^2)
        #   |d| = asinh(|z|) = log(|z| + sqrt(z^2+1))
        # 3 sqrt + 1 log on the EUP, no divide, no where/select sign chain.
        z = p * jnp.sqrt(q * q + 1.0) - q * jnp.sqrt(p * p + 1.0)
        az = jnp.abs(z)
        ad = jnp.log(az + jnp.sqrt(az * az + 1.0))
        # SmoothL1 / Huber (needs only |d| and d^2).
        loss = jnp.where(ad < beta, inv_2beta * (ad * ad), ad - half_beta)
        # (block_rows, 128) -> (8, 128): leading-axis sum = pure vreg adds; the
        # cross-lane/sublane reduce happens once in the wrapper.
        return loss.reshape(-1, SUBLANE, LANE).sum(axis=0)

    def kernel(pred_ref, tgt_ref, acc_ref):
        t = pl.program_id(1)

        # Zero the resident per-partial accumulator at the start of the reduction axis.
        @pl.when(t == 0)
        def _init():
            acc_ref[...] = jnp.zeros_like(acc_ref)

        p = pred_ref[...].astype(jnp.float32)
        q = tgt_ref[...].astype(jnp.float32)

        if not need_mask:
            # Blocks tile the slab exactly: no mask code emitted at all.
            acc_ref[...] += partial_sum(p, q)
        else:
            # Only the boundary block pays for the mask (pl.when cold path is
            # skipped at runtime for interior blocks).
            base = (pl.program_id(0) * steps + t) * block_rows
            at_boundary = base + block_rows > rows_valid

            @pl.when(jnp.logical_not(at_boundary))
            def _fast():
                acc_ref[...] += partial_sum(p, q)

            @pl.when(at_boundary)
            def _masked():
                rid = jax.lax.broadcasted_iota(jnp.int32, p.shape, 0)
                valid = (base + rid) < rows_valid
                # Mask inputs (not the loss) so stale/garbage rows beyond the
                # array can never inject NaN/Inf: loss(0,0) == 0 exactly.
                acc_ref[...] += partial_sum(jnp.where(valid, p, 0.0),
                                            jnp.where(valid, q, 0.0))

    return kernel


def transformed_loss(prediction: jax.Array, target: jax.Array, *, beta: float = 1.0) -> jax.Array:
    assert prediction.shape == target.shape
    n_elems = int(prediction.size)

    if n_elems % LANE == 0:
        # Free reshape into a lane-dense slab: no padded HBM copy.
        def to_slab(x):
            return x.reshape(-1, LANE)
        n_slab = n_elems
    else:
        # TODO(synk): the <128-element tail sliver still forces one padded copy
        # (jnp.pad materializes); only hit when numel % 128 != 0.  Padded zeros
        # contribute exactly 0 loss, so only n_elems enters the mean.
        n_slab = _round_up(n_elems, LANE)

        def to_slab(x):
            return jnp.pad(x.reshape(-1), (0, n_slab - n_elems)).reshape(-1, LANE)

    rows = n_slab // LANE

    # --- Block sizing (no over-padding; waste bounded by ~total_blocks*16 rows) ---
    blk0 = min(TARGET_BLOCK_ROWS, _round_up(pl.cdiv(rows, NUM_PARTIALS), ROW_ALIGN))
    needed = pl.cdiv(rows, blk0)                 # minimal #blocks to cover `rows`
    p_eff = min(NUM_PARTIALS, needed)            # shrink partials for tiny inputs
    steps = pl.cdiv(needed, p_eff)
    total_blocks = p_eff * steps
    block_rows = min(TARGET_BLOCK_ROWS, _round_up(pl.cdiv(rows, total_blocks), ROW_ALIGN))
    last_block = pl.cdiv(rows, block_rows) - 1   # last block index with a valid start row
    need_mask = total_blocks * block_rows != rows
    # Guarantee no DMA ever starts fully out of bounds (clamped blocks are
    # masked to zero contribution by the logical row mask above).
    need_clamp = (total_blocks - 1) * block_rows >= rows

    if need_clamp:
        def in_idx(pi, ti):
            return (jnp.minimum(pi * steps + ti, last_block), 0)
    else:
        def in_idx(pi, ti):
            return (pi * steps + ti, 0)

    kernel = _make_kernel(float(beta), block_rows, steps, rows, need_mask)

    partials = pl.pallas_call(
        kernel,
        out_shape=jax.ShapeDtypeStruct((p_eff * SUBLANE, LANE), jnp.float32),
        grid_spec=pltpu.PrefetchScalarGridSpec(
            num_scalar_prefetch=0,
            grid=(p_eff, steps),
            in_specs=[
                pl.BlockSpec((block_rows, LANE), in_idx),
                pl.BlockSpec((block_rows, LANE), in_idx),
            ],
            out_specs=pl.BlockSpec((SUBLANE, LANE), lambda pi, ti: (pi, 0)),
        ),
        compiler_params=pltpu.CompilerParams(
            # partial axis can shard across TensorCores; inner axis reduces into
            # the resident accumulator block.
            dimension_semantics=("parallel", "arbitrary"),
            # 2 inputs x 2 buffers x 4 MiB = 16 MiB; raise the scoped limit
            # explicitly so v5e's 16 MiB default doesn't fall over.
            vmem_limit_bytes=32 * 1024 * 1024,
        ),
    )(to_slab(prediction), to_slab(target))

    # Final cross-lane/sublane reduce + 'mean' normalization in plain JAX.
    return jnp.sum(partials) / float(n_elems)


def _reference(prediction, target, beta=1.0):
    p = jnp.arcsinh(prediction.astype(jnp.float32))
    t = jnp.arcsinh(target.astype(jnp.float32))
    d = p - t
    ad = jnp.abs(d)
    loss = jnp.where(ad < beta, 0.5 * d * d / beta, ad - 0.5 * beta)
    return jnp.mean(loss)


if __name__ == "__main__":
    key = jax.random.PRNGKey(0)
    # Small shapes consistent with the module's example usage:
    #  (16, 256): numel % 128 == 0, exact tiling (zero-copy, no mask path)
    #  (10, 384): numel % 128 == 0, ragged block count (zero-copy, masked boundary)
    #  (3, 100) : numel % 128 != 0 (tail-sliver pad + masked boundary)
    for shape in [(16, 256), (10, 384), (3, 100)]:
        key, kp, kt = jax.random.split(key, 3)
        pred = jax.random.normal(kp, shape, dtype=jnp.float32)
        tgt = jax.random.normal(kt, shape, dtype=jnp.float32)

        loss = jax.block_until_ready(transformed_loss(pred, tgt))
        ref = _reference(pred, tgt)
        assert jnp.allclose(loss, ref, rtol=1e-5, atol=1e-5), (shape, loss, ref)

    print("KERNEL_OK")
</pallas_src>

<mosaic_0001>
module attributes {stable_mosaic.version = 11 : i64} {
  func.func @kernel(%arg0: i32, %arg1: i32, %arg2: memref<16x128xf32, #tpu.memory_space<vmem>>, %arg3: memref<16x128xf32, #tpu.memory_space<vmem>>, %arg4: memref<8x128xf32, #tpu.memory_space<vmem>>) attributes {dimension_semantics = [#tpu.dimension_semantics<parallel>, #tpu.dimension_semantics<arbitrary>], iteration_bounds = array<i64: 2, 1>, scalar_prefetch = 0 : i64, scratch_operands = 0 : i64, tpu.core_type = #tpu.core_type<tc>, window_params = [{transform_indices = @transform_0, window_bounds = array<i64: 16, 128>}, {transform_indices = @transform_1, window_bounds = array<i64: 16, 128>}, {transform_indices = @transform_2, window_bounds = array<i64: 8, 128>}]} {
    %c0_i32 = arith.constant 0 : i32
    %0 = arith.cmpi eq, %arg1, %c0_i32 : i32
    %1 = arith.extui %0 : i1 to i32
    %c0_i32_0 = arith.constant 0 : i32
    %2 = arith.cmpi ne, %1, %c0_i32_0 : i32
    scf.if %2 {
      %cst_14 = arith.constant 0.000000e+00 : f32
      %36 = vector.broadcast %cst_14 : f32 to vector<8x128xf32>
      %c0_15 = arith.constant 0 : index
      %c0_16 = arith.constant 0 : index
      %37 = vector.load %arg4[%c0_15, %c0_16] : memref<8x128xf32, #tpu.memory_space<vmem>>, vector<8x128xf32>
      tpu.vector_store %arg4[%c0_15, %c0_16], %36 {strides = array<i32>} : memref<8x128xf32, #tpu.memory_space<vmem>>, vector<8x128xf32>,
    } else {
    }
    %c0 = arith.constant 0 : index
    %c0_1 = arith.constant 0 : index
    %3 = vector.load %arg2[%c0, %c0_1] : memref<16x128xf32, #tpu.memory_space<vmem>>, vector<16x128xf32>
    %c0_2 = arith.constant 0 : index
    %c0_3 = arith.constant 0 : index
    %4 = vector.load %arg3[%c0_2, %c0_3] : memref<16x128xf32, #tpu.memory_space<vmem>>, vector<16x128xf32>
    %c0_4 = arith.constant 0 : index
    %c0_5 = arith.constant 0 : index
    %5 = vector.load %arg4[%c0_4, %c0_5] : memref<8x128xf32, #tpu.memory_space<vmem>>, vector<8x128xf32>
    %6 = arith.mulf %4, %4 : vector<16x128xf32>
    %cst = arith.constant 1.000000e+00 : f32
    %7 = vector.broadcast %cst : f32 to vector<16x128xf32>
    %8 = arith.addf %6, %7 : vector<16x128xf32>
    %9 = math.sqrt %8 : vector<16x128xf32>
    %10 = arith.mulf %3, %9 : vector<16x128xf32>
    %11 = arith.mulf %3, %3 : vector<16x128xf32>
    %cst_6 = arith.constant 1.000000e+00 : f32
    %12 = vector.broadcast %cst_6 : f32 to vector<16x128xf32>
    %13 = arith.addf %11, %12 : vector<16x128xf32>
    %14 = math.sqrt %13 : vector<16x128xf32>
    %15 = arith.mulf %4, %14 : vector<16x128xf32>
    %16 = arith.subf %10, %15 : vector<16x128xf32>
    %17 = math.absf %16 : vector<16x128xf32>
    %18 = arith.mulf %17, %17 : vector<16x128xf32>
    %cst_7 = arith.constant 1.000000e+00 : f32
    %19 = vector.broadcast %cst_7 : f32 to vector<16x128xf32>
    %20 = arith.addf %18, %19 : vector<16x128xf32>
    %21 = math.sqrt %20 : vector<16x128xf32>
    %22 = arith.addf %17, %21 : vector<16x128xf32>
    %23 = math.log %22 : vector<16x128xf32>
    %cst_8 = arith.constant 1.000000e+00 : f32
    %24 = vector.broadcast %cst_8 : f32 to vector<16x128xf32>
    %25 = arith.cmpf olt, %23, %24 : vector<16x128xf32>
    %26 = arith.mulf %23, %23 : vector<16x128xf32>
    %cst_9 = arith.constant 5.000000e-01 : f32
    %27 = vector.broadcast %cst_9 : f32 to vector<16x128xf32>
    %28 = arith.mulf %27, %26 : vector<16x128xf32>
    %cst_10 = arith.constant 5.000000e-01 : f32
    %29 = vector.broadcast %cst_10 : f32 to vector<16x128xf32>
    %30 = arith.subf %23, %29 : vector<16x128xf32>
    %31 = arith.select %25, %28, %30 : vector<16x128xi1>, vector<16x128xf32>
    %32 = vector.shape_cast %31 : vector<16x128xf32> to vector<2x8x128xf32>
    %cst_11 = arith.constant dense<0.000000e+00> : vector<8x128xf32>
    %33 = vector.multi_reduction <add>, %32, %cst_11 [0] : vector<2x8x128xf32> to vector<8x128xf32>
    %34 = arith.addf %5, %33 : vector<8x128xf32>
    %c0_12 = arith.constant 0 : index
    %c0_13 = arith.constant 0 : index
    %35 = vector.load %arg4[%c0_12, %c0_13] : memref<8x128xf32, #tpu.memory_space<vmem>>, vector<8x128xf32>
    tpu.vector_store %arg4[%c0_12, %c0_13], %34 {strides = array<i32>} : memref<8x128xf32, #tpu.memory_space<vmem>>, vector<8x128xf32>,
    return
  }
  func.func @transform_0(%arg0: i32, %arg1: i32) -> (i32, i32) {
    %c1_i32 = arith.constant 1 : i32
    %0 = arith.muli %arg0, %c1_i32 : i32
    %1 = arith.addi %0, %arg1 : i32
    %c0_i32 = arith.constant 0 : i32
    %c0_i32_0 = arith.constant 0 : i32
    return %1, %c0_i32 : i32, i32
  }
  func.func @transform_1(%arg0: i32, %arg1: i32) -> (i32, i32) {
    %c1_i32 = arith.constant 1 : i32
    %0 = arith.muli %arg0, %c1_i32 : i32
    %1 = arith.addi %0, %arg1 : i32
    %c0_i32 = arith.constant 0 : i32
    %c0_i32_0 = arith.constant 0 : i32
    return %1, %c0_i32 : i32, i32
  }
  func.func @transform_2(%arg0: i32, %arg1: i32) -> (i32, i32) {
    %c0_i32 = arith.constant 0 : i32
    %c0_i32_0 = arith.constant 0 : i32
    return %arg0, %c0_i32 : i32, i32
  }
}

</mosaic_0001>

<bundles_post_ra>
// kernel: tpu_custom_call.1
= control target key start
LH: loop header
LB: loop body
LE: loop exit
PB: predicated region body
PF: predicated region fallthrough
CT: control target
= control target key end

     0   :  { %7 = vsyncpa [#allocation3], 0  ;;  %s945_s0 = inlined_call_operand.hbm [shape: f32[32,128], index: 0, kind: input, shape index: {}]   ;;  %s946_s1 = inlined_call_operand.hbm [shape: f32[32,128], index: 1, kind: input, shape index: {}]   ;;  %s947_s2 = inlined_call_operand.hbm [shape: f32[16,128], index: 2, kind: output, shape index: {}]  }
   0x1   :  { %9 = vsyncpa [#allocation3 + $0x1], 0 }
   0x2   :  { %10 = vsyncpa [#allocation6], 0 }
   0x3   :  { %12 = vsyncpa [#allocation6 + $0x1], 0 }
   0x4   :  { %13 = vsyncpa [#allocation4], 0 }
   0x5   :  { %15 = vsyncpa [#allocation4 + $0x1], 0  ;;  %s708_s9 = smov 0   ;;  %s710_s10 = smov 0  }
   0x6   :  { %s712_s11 = smov 0   ;;  %s714_s12 = smov 0  }
   0x7   :  { %s716_s13 = smov 0   ;;  %s718_s14 = smov 0  }
   0x8 LB: > { %s432_s15 = sadd.s32 4294967295, %s686_s14   ;;  %s433_s16 = sadd.s32 4294967294, %s686_s14   ;;  %s686_s14 = sphi %s718_s14, %s21_s14   ;;  %s682_s13 = sphi %s716_s13, %s965_s13   ;;  %s678_s12 = sphi %s714_s12, %s964_s12   ;;  %s674_s11 = sphi %s712_s11, %s963_s11   ;;  %s670_s10 = sphi %s710_s10, %s962_s10   ;;  %s666_s9 = sphi %s708_s9, %s961_s9  }
   0x9   : > { %s33_s17 = sadd.s32 1, %s682_s13  ;;  %s42_s18 = sadd.s32 1, %s674_s11 }
   0xa   : > { %p35_p0 = scmp.ge.s32.totalorder %s33_s17, 2  ;;  %p49_p1 = scmp.ne.s32.totalorder %s674_s11, %s670_s10 }
   0xb   : > { %p50_p2 = scmp.eq.s32.totalorder %s686_s14, 0  ;;  %p55_p3 = scmp.ne.s32.totalorder %s670_s10, %s666_s9 }
   0xc   : > { %s967_s17 = smov (%p35_p0, %s33_s17), 0  ;;  %p56_p5 = scmp.eq.s32.totalorder %s432_s15, 0 }
   0xd   : > { %p749_p4 = por %p50_p2, %p49_p1  ;;  %s39_s20 = ssub.s32 %s682_s13, %s967_s17 }
   0xe   : > { %p107_p6 = scmp.eq.s32.totalorder %s432_s15, 1  ;;  %p40_p7 = scmp.eq.s32.totalorder %s39_s20, 0 }
   0xf   : > { %p755_p8 = por %p56_p5, %p55_p3  ;;  %p113_p10 = scmp.eq.s32.totalorder %s433_s16, 1 }
  0x10   : > { %p759_p9 = por %p107_p6, %p49_p1  ;;  %p471_p13 = scmp.lt.s32.totalorder %s686_s14, 2 }
  0x11   : > { %s951_s21 = scalar_select %p755_p8, 1, 0 }
  0x12   : > { %s952_s22 = scalar_select %p759_p9, 1, 0 }
  0x13   : > { %s764_s23 = scalar_select %p40_p7, %s674_s11, %s42_s18  }
  0x14   : > { %p766_p11 = por %p113_p10, %p55_p3  ;;  %s773_s25 = sand.u32 1, %s674_s11  }
  0x15   : > { %s436_s26 = sshll.u32 %s773_s25, 4  ;;  %s452_s27 = sshll.u32 %s682_s13, 8 }
  0x16   : > { %s953_s24 = scalar_select %p766_p11, 1, 0 }
  0x17   : > { %s782_s30 = scalar_lea.hbm %s945_s0, %s452_s27  ;;  %s137_s3 = scalar_lea.vmem [#allocation2], %s436_s26 }
  0x18   : > { %s145_s4 = sshll.u32 %s137_s3, 4  ;;  %p790_p0 = pnand %p471_p13, %p749_p4  ;;  %s786_s4 = int_to_ptr.vmem [resolvable:$true] %s145_s4 }
  0x19   : > { %s134_s6 = scalar_lea.sflag [#allocation3], %s773_s25  ;;  %s540_s7 = scalar_lea.hbm %s782_s30, 256 }
  0x1a   : > { %p541_p2 = scmp.ne.s32.totalorder %s782_s30, %s540_s7  ;;  %p542_p3 = pneg %p790_p0 }
  0x1b   : > { %s545_s16 = scalar_lea.hbm %s945_s0, 512  ;;  %p546_p4 = scmp.lt.u32.totalorder %s782_s30, %s945_s0 }
  0x1c   : > { %p543_p5 = pnand %p542_p3, %p541_p2  ;;  %p547_p7 = scmp.lt.u32.totalorder %s545_s16, %s540_s7 }
  0x1d   : > { %p549_p13 = scmp.lt.u32.totalorder %s540_s7, %s782_s30 }
  0x1e   : > { %p544_p6 = pneg %p543_p5  ;;  %p548_p10 = por %p547_p7, %p546_p4 }
  0x20   : > { %p550_p12 = por %p549_p13, %p548_p10 }
  0x22   : > { %p551_p1 = pnand %p550_p12, %p544_p6 }
  0x24   : > { %554 = shalt.err (!%p551_p1)
}
  0x25   : > { %s555_s20 = scalar_lea.vmem %s786_s4, 256  ;;  %s688_s28 = smov [#allocation2]  }
  0x26   : > { %p556_p2 = scmp.ne.s32.totalorder %s786_s4, %s555_s20  ;;  %s560_s29 = sshll.u32 %s688_s28, 4  ;;  %s561_s29 = int_to_ptr.vmem [resolvable:$false] %s560_s29 }
  0x27   : > { %s562_s3 = scalar_lea.vmem %s561_s29, 512  ;;  %p563_p9 = scmp.lt.s32.totalorder %s786_s4, %s561_s29 }
  0x28   : > { %p558_p5 = pnand %p556_p2, %p542_p3  ;;  %p564_p4 = scmp.lt.s32.totalorder %s562_s3, %s555_s20 }
  0x2a   : > { %p559_p11 = pneg %p558_p5  ;;  %p565_p7 = por %p564_p4, %p563_p9 }
  0x2c   : > { %p566_p10 = pnand %p565_p7, %p559_p11 }
  0x2e   : > { %569 = shalt.err (!%p566_p10)
}
  0x2f   : > { %s689_s7 = smov 128   ;;  %s690_s8 = smov 8  }
  0x30   : > { %463 = dma.hbm_to_vmem [thread:$0]  (!%p790_p0), %s782_s30, 256, %s786_s4, %s134_s6, %s689_s7, %s689_s7, %s690_s8  }
  0x31   : > { %p175_p9 = scmp.lt.s32.totalorder %s686_s14, 3  ;;  %s832_s18 = scalar_lea.hbm %s946_s1, %s452_s27 }
  0x32   : > { %p955_p11 = scmp.ge.s32.totalorder %s686_s14, 1  ;;  %s159_s20 = scalar_lea.vmem [#allocation5], %s436_s26 }
  0x33   : > { %s167_s28 = sshll.u32 %s159_s20, 4  ;;  %s156_s30 = scalar_lea.sflag [#allocation6], %s773_s25  ;;  %s842_s28 = int_to_ptr.vmem [resolvable:$true] %s167_s28 }
  0x34   : > { %p836_p12 = pnand %p955_p11, %p175_p9  ;;  %s570_s4 = scalar_lea.hbm %s832_s18, 256 }
  0x35   : > { %p571_p1 = scmp.ne.s32.totalorder %s832_s18, %s570_s4  ;;  %s575_s29 = scalar_lea.hbm %s946_s1, 512 }
  0x36   : > { %p576_p2 = scmp.lt.u32.totalorder %s832_s18, %s946_s1  ;;  %p577_p5 = scmp.lt.u32.totalorder %s575_s29, %s570_s4 }
  0x37   : > { %p573_p6 = pnand %p571_p1, %p542_p3  ;;  %p579_p7 = scmp.lt.u32.totalorder %s570_s4, %s832_s18 }
  0x38   : > { %p578_p4 = por %p577_p5, %p576_p2 }
  0x39   : > { %p574_p13 = pneg %p573_p6 }
  0x3a   : > { %p580_p10 = por %p579_p7, %p578_p4 }
  0x3c   : > { %p581_p9 = pnand %p580_p10, %p574_p13 }
  0x3e   : > { %584 = shalt.err (!%p581_p9)
}
  0x3f   : > { %s585_s26 = scalar_lea.vmem %s842_s28, 256  ;;  %s691_s16 = smov [#allocation5]  }
  0x40   : > { %p586_p11 = scmp.ne.s32.totalorder %s842_s28, %s585_s26  ;;  %s590_s20 = sshll.u32 %s691_s16, 4  ;;  %s591_s20 = int_to_ptr.vmem [resolvable:$false] %s590_s20 }
  0x41   : > { %s592_s27 = scalar_lea.vmem %s591_s20, 512  ;;  %p593_p8 = scmp.lt.s32.totalorder %s842_s28, %s591_s20 }
  0x42   : > { %p588_p1 = pnand %p586_p11, %p542_p3  ;;  %p594_p2 = scmp.lt.s32.totalorder %s592_s27, %s585_s26 }
  0x44   : > { %p589_p6 = pneg %p588_p1  ;;  %p595_p5 = por %p594_p2, %p593_p8 }
  0x46   : > { %p596_p4 = pnand %p595_p5, %p589_p6 }
  0x48   : > { %599 = shalt.err (!%p596_p4)
}
  0x49   : > { %466 = dma.hbm_to_vmem [thread:$0]  (!%p790_p0), %s832_s18, 256, %s842_s28, %s156_s30, %s689_s7, %s689_s7, %s690_s8  }
  0x4a   : > { %179 = sbr.rel (%p836_p12) target bundleno = 169 (0xa9), region = 28  ;;  %s876_s4 = sand.u32 (!%p836_p12), 1, %s670_s10  }
  0x4b   : > { %s443_s6 = sshll.u32 (!%p836_p12), %s876_s4, 4  ;;  %s182_s29 = scalar_lea.sflag (!%p836_p12), [#allocation3], %s876_s4 }
  0x4c   : > { %s185_s5 = scalar_lea.vmem (!%p836_p12), [#allocation2], %s443_s6  ;;  %p957_p8 = scmp.ne.s32.totalorder (!%p836_p12), %s951_s21, 0 }
  0x51   : > { %653 = dma.done.wait (%p957_p8), %s182_s29, 256  }
  0x52   : > { %655 = vsyncadd (%p957_p8), %s182_s29, 4294967040  ;;  %s191_s25 = scalar_lea.sflag [#allocation6], %s876_s4  ;;  %s194_s7 = scalar_lea.vmem [#allocation5], %s443_s6 }
  0x53   : > { %657 = dma.done.wait (%p957_p8), %s191_s25, 256  }
  0x54   : > { %659 = vsyncadd (%p957_p8), %s191_s25, 4294967040  ;;  %v229_v0 = vld [vmem:[%s185_s5] sm:$0xff]  ;;  %v230_v1 = vld [vmem:[%s185_s5 + $0x8] sm:$0xff]  ;;  %s445_s21 = sshll.u32 %s876_s4, 3  ;;  %s449_s8 = sshll.u32 %s678_s12, 7 }
  0x55   : > { %v231_v2 = vld [vmem:[%s194_s7] sm:$0xff]  ;;  %v232_v3 = vld [vmem:[%s194_s7 + $0x8] sm:$0xff]  ;;  %v254_v5 = vmul.f32 %v229_v0, %v229_v0  ;;  %v255_v6 = vmul.f32 %v230_v1, %v230_v1  ;;  %s219_s18 = scalar_lea.vmem [#allocation7], %s445_s21  ;;  %s896_s3 = scalar_lea.hbm %s947_s2, %s449_s8 }
  0x56   : > { %v234_v4 = vmul.f32 %v231_v2, %v231_v2  ;;  %v235_v7 = vmul.f32 %v232_v3, %v232_v3  ;;  %s329_s19 = sshll.u32 %s219_s18, 4  ;;  %s316_s15 = scalar_lea.sflag [#allocation4], %s876_s4  ;;  %s898_s19 = int_to_ptr.vmem [resolvable:$true] %s329_s19 }
  0x57   : > { %v256_v9 = vadd.f32 1.0, %v254_v5  ;;  %v257_v11 = vadd.f32 1.0, %v255_v6  ;;  %s600_s26 = scalar_lea.vmem %s898_s19, 128  ;;  %p958_p3 = scmp.ne.s32.totalorder %s952_s22, 0 }
  0x58   : > { %v236_v8 = vadd.f32 1.0, %v234_v4  ;;  %v237_v10 = vadd.f32 1.0, %v235_v7  ;;  %p601_p0 = scmp.ne.s32.totalorder %s898_s19, %s600_s26  ;;  %s692_s12 = smov [#allocation7]  }
  0x59   : > { %vm260_vm4 = vcmp.eq.f32.partialorder %v256_v9, inf  ;;  %vm262_vm5 = vcmp.eq.f32.partialorder %v256_v9, 0.0  ;;  %v263_v19 = vand.u32 2147483648, %v256_v9  ;;  %vm267_vm6 = vcmp.eq.f32.partialorder %v257_v11, inf  ;;  %s604_s16 = sshll.u32 %s692_s12, 4  ;;  %s605_s16 = int_to_ptr.vmem [resolvable:$false] %s604_s16 }
  0x5a   : > { %524 = vrsqrt.f32 %v236_v8  ;;  %vm240_vm0 = vcmp.eq.f32.partialorder %v236_v8, inf  ;;  %vm242_vm1 = vcmp.eq.f32.partialorder %v236_v8, 0.0  ;;  %v243_v13 = vand.u32 2147483648, %v236_v8  ;;  %p602_p12 = pnand %p601_p0, %p958_p3  ;;  %s606_s20 = scalar_lea.vmem %s605_s16, 256 }
  0x5b   : > { %526 = vrsqrt.f32 %v237_v10  ;;  %vm247_vm2 = vcmp.eq.f32.partialorder %v237_v10, inf  ;;  %vm249_vm3 = vcmp.eq.f32.partialorder %v237_v10, 0.0  ;;  %v250_v16 = vand.u32 2147483648, %v237_v10  ;;  %p607_p7 = scmp.lt.s32.totalorder %s898_s19, %s605_s16  ;;  %p608_p10 = scmp.lt.s32.totalorder %s606_s20, %s600_s26 }
  0x5c   : > { %528 = vrsqrt.f32 %v256_v9  ;;  %v270_v23 = vand.u32 2147483648, %v257_v11  ;;  %vm269_vm7 = vcmp.eq.f32.partialorder %v257_v11, 0.0  ;;  %p603_p13 = pneg %p602_p12 }
  0x5d   : > { %530 = vrsqrt.f32 %v257_v11  ;;  %p609_p9 = por %p608_p10, %p607_p7 }
  0x5f   : > { %p610_p11 = pnand %p609_p9, %p603_p13 }
  0x64   : > { %v525_v12 = vpop.eup %524 }
  0x65   : > { %v527_v14 = vpop.eup %526  ;;  %v239_v15 = vmul.f32 %v525_v12, %v236_v8 }
  0x66   : > { %v529_v17 = vpop.eup %528  ;;  %v246_v18 = vmul.f32 %v527_v14, %v237_v10 }
  0x67   : > { %v531_v20 = vpop.eup %530  ;;  %v241_v21 = vsel %vm240_vm0, %v236_v8, %v239_v15  ;;  %v259_v22 = vmul.f32 %v529_v17, %v256_v9 }
  0x68   : > { %v244_v24 = vsel %vm242_vm1, %v243_v13, %v241_v21  ;;  %v248_v25 = vsel %vm247_vm2, %v237_v10, %v246_v18  ;;  %v266_v26 = vmul.f32 %v531_v20, %v257_v11 }
  0x69   : > { %v251_v27 = vsel %vm249_vm3, %v250_v16, %v248_v25  ;;  %v252_v28 = vmul.f32 %v244_v24, %v229_v0  ;;  %v261_v29 = vsel %vm260_vm4, %v256_v9, %v259_v22 }
  0x6a   : > { %v253_v30 = vmul.f32 %v251_v27, %v230_v1  ;;  %v264_v31 = vsel %vm262_vm5, %v263_v19, %v261_v29  ;;  %v268_v32 = vsel %vm267_vm6, %v257_v11, %v266_v26 }
  0x6b   : > { %v271_v33 = vsel %vm269_vm7, %v270_v23, %v268_v32  ;;  %v272_v34 = vmul.f32 %v264_v31, %v231_v2 }
  0x6c   : > { %v273_v35 = vmul.f32 %v271_v33, %v232_v3 }
  0x6d   : > { %v274_v36 = vsub.f32 %v252_v28, %v272_v34 }
  0x6e   : > { %v275_v37 = vsub.f32 %v253_v30, %v273_v35 }
  0x6f   : > { %v276_v38 = vand.u32 2147483647, %v274_v36 }
  0x70   : > { %v277_v39 = vand.u32 2147483647, %v275_v37 }
  0x71   : > { %v278_v40 = vmul.f32 %v276_v38, %v276_v38 }
  0x72   : > { %v279_v41 = vmul.f32 %v277_v39, %v277_v39 }
  0x73   : > { %v280_v42 = vadd.f32 1.0, %v278_v40 }
  0x74   : > { %v281_v43 = vadd.f32 1.0, %v279_v41 }
  0x75   : > { %532 = vrsqrt.f32 %v280_v42  ;;  %vm284_vm8 = vcmp.eq.f32.partialorder %v280_v42, inf  ;;  %v287_v45 = vand.u32 2147483648, %v280_v42  ;;  %vm286_vm9 = vcmp.eq.f32.partialorder %v280_v42, 0.0 }
  0x76   : > { %534 = vrsqrt.f32 %v281_v43  ;;  %vm291_vm10 = vcmp.eq.f32.partialorder %v281_v43, inf  ;;  %v294_v48 = vand.u32 2147483648, %v281_v43  ;;  %vm293_vm11 = vcmp.eq.f32.partialorder %v281_v43, 0.0 }
  0x7f   : > { %v533_v44 = vpop.eup %532 }
  0x80   : > { %v535_v46 = vpop.eup %534  ;;  %v283_v47 = vmul.f32 %v533_v44, %v280_v42 }
  0x81   : > { %v290_v49 = vmul.f32 %v535_v46, %v281_v43 }
  0x82   : > { %v285_v50 = vsel %vm284_vm8, %v280_v42, %v283_v47 }
  0x83   : > { %v288_v51 = vsel %vm286_vm9, %v287_v45, %v285_v50  ;;  %v292_v52 = vsel %vm291_vm10, %v281_v43, %v290_v49 }
  0x84   : > { %v295_v53 = vsel %vm293_vm11, %v294_v48, %v292_v52  ;;  %v296_v54 = vadd.f32 %v288_v51, %v276_v38 }
  0x85   : > { %v297_v55 = vadd.f32 %v295_v53, %v277_v39 }
  0x86   : > { %536 = vlog2.f32 %v296_v54 }
  0x87   : > { %538 = vlog2.f32 %v297_v55 }
  0x90   : > { %v537_v56 = vpop.eup %536 }
  0x91   : > { %v539_v57 = vpop.eup %538  ;;  %v299_v58 = vmul.f32 0.6931472, %v537_v56 }
  0x92   : > { %v301_v59 = vmul.f32 0.6931472, %v539_v57 }
  0x93   : > { %v304_v60 = vmul.f32 %v299_v58, %v299_v58  ;;  %v446_v61 = vadd.f32 -0.5, %v299_v58  ;;  %vm302_vm12 = vcmp.lt.f32.partialorder %v299_v58, 1.0 }
  0x94   : > { %v305_v62 = vmul.f32 %v301_v59, %v301_v59  ;;  %v447_v63 = vadd.f32 -0.5, %v301_v59  ;;  %vm303_vm13 = vcmp.lt.f32.partialorder %v301_v59, 1.0 }
  0x95   : > { %v306_v0 = vmul.f32 0.5, %v304_v60 }
  0x96   : > { %v307_v1 = vmul.f32 0.5, %v305_v62 }
  0x97   : > { %v310_v2 = vsel %vm302_vm12, %v306_v0, %v446_v61 }
  0x98   : > { %v311_v3 = vsel %vm303_vm13, %v307_v1, %v447_v63 }
  0x99   : > { %v312_v4 = vadd.f32 %v311_v3, %v310_v2 }
  0x9b   : > { %314 = vst [vmem:[%s219_s18] sm:$0xff] %v312_v4 }
  0x9c   : > { %613 = shalt.err (!%p610_p11)
}
  0x9d   : > { %s614_s27 = scalar_lea.hbm %s896_s3, 128  ;;  %s618_s29 = scalar_lea.hbm %s947_s2, 256 }
  0x9e   : > { %p615_p1 = scmp.ne.s32.totalorder %s896_s3, %s614_s27  ;;  %p619_p5 = scmp.lt.u32.totalorder %s896_s3, %s947_s2 }
  0x9f   : > { %p620_p4 = scmp.lt.u32.totalorder %s618_s29, %s614_s27  ;;  %p622_p0 = scmp.lt.u32.totalorder %s614_s27, %s896_s3 }
  0xa0   : > { %p616_p6 = pnand %p615_p1, %p958_p3 }
  0xa1   : > { %p621_p8 = por %p620_p4, %p619_p5 }
  0xa2   : > { %p617_p2 = pneg %p616_p6 }
  0xa3   : > { %p623_p12 = por %p622_p0, %p621_p8 }
  0xa5   : > { %p624_p13 = pnand %p623_p12, %p617_p2 }
  0xa7   : > { %627 = shalt.err (!%p624_p13)
}
  0xa8   : > { %458 = dma.vmem_to_hbm [thread:$0]  (%p958_p3), %s898_s19, 128, %s896_s3, %s316_s15  }
  0xa9 PF: > { %s341_s7 = sand.u32 1, %s666_s9   ;;  %p959_p7 = scmp.ne.s32.totalorder %s953_s24, 0 }
  0xaa   : > { %p960_p10 = scmp.ge.s32.totalorder %s686_s14, 2  ;;  %s342_s21 = scalar_lea.sflag [#allocation4], %s341_s7 }
  0xac   : > { %p468_p9 = pnand %p960_p10, %p959_p7 }
  0xae   : > { %661 = dma.done.wait (!%p468_p9), %s342_s21, 128  }
  0xaf   : > { %663 = vsyncadd (!%p468_p9), %s342_s21, 4294967168  ;;  %s21_s14 = sadd.s32 1, %s686_s14   ;;  %s961_s9 = smov %s670_s10 }
  0xb0   : > { %p18_p11 = scmp.ge.s32.totalorder %s21_s14, 4   ;;  %s962_s10 = smov %s674_s11 }
  0xb1   : > { %s963_s11 = smov %s764_s23  ;;  %s964_s12 = smov %s682_s13 }
  0xb2   : > { %s965_s13 = smov %s967_s17  ;;  %20 = sbr.rel (!%p18_p11) target bundleno = 8 (0x8), region = 90 }
  0xb9   :  { %347 = vsyncpa [#allocation3], 1 }
  0xba   :  { %349 = vsyncpa [#allocation3 + $0x1], 1 }
  0xbb   :  { %350 = vsyncpa [#allocation6], 1 }
  0xbc   :  { %352 = vsyncpa [#allocation6 + $0x1], 1 }
  0xbd   :  { %353 = vsyncpa [#allocation4], 1 }
  0xbe   :  { %355 = vsyncpa [#allocation4 + $0x1], 1 }

</bundles_post_ra>
